<compile_context>
chip_gen: v6e
topology: v6e:2x2x1
jax: 0.10.0
libtpu: 0.0.40
codegen_flags: <defaults>
</compile_context>

<pallas_src>
import jax
import jax.numpy as jnp
from jax.experimental import pallas as pl
from jax.experimental.pallas import tpu as pltpu

IN_CHANNELS = 256
OUT_CHANNELS = 10  # per_pixel * 10 with per_pixel = 1


def _cls_head_kernel(x_ref, w_ref, b_ref, o_ref):
    # x_ref: (256, tp)   w_ref: (10, 256)   b_ref: (10, 1)   o_ref: (10, tp)
    acc = jnp.dot(w_ref[...], x_ref[...], preferred_element_type=jnp.float32)
    o_ref[...] = (acc + b_ref[...]).astype(o_ref.dtype)


def _pick_pixel_tile(hw, target=2048):
    """Largest tile <= target that is a multiple of 128 and divides hw.

    If hw is not a multiple of 128, fall back to a single full-width block
    (block dim == full array dim is always legal), which also avoids any
    padding / ragged-tail handling.
    """
    if hw % 128 != 0:
        return hw
    tp = min(target, hw)
    tp -= tp % 128
    while hw % tp != 0:
        tp -= 128
    return tp


def classification_head_forward(x_nchw, weight, bias, *, pixel_tile=2048):
    """Forward of ClassificationHead.

    x_nchw: (B, 256, H, W) f32. weight: (10, 256, 1, 1). bias: (10,).
    Returns (B*H*W, 10), identical to x.permute(0,2,3,1).reshape(-1,10) in
    the PyTorch module.
    """
    B, C, H, W = x_nchw.shape
    assert C == IN_CHANNELS
    HW = H * W

    # Contiguous reshape -- no data movement, NCHW is read directly.
    x3d = x_nchw.reshape(B, C, HW)
    w2d = weight.reshape(OUT_CHANNELS, IN_CHANNELS)
    b2d = bias.reshape(OUT_CHANNELS, 1)

    tp = _pick_pixel_tile(HW, pixel_tile)

    out3d = pl.pallas_call(
        _cls_head_kernel,
        out_shape=jax.ShapeDtypeStruct((B, OUT_CHANNELS, HW), x_nchw.dtype),
        grid_spec=pltpu.PrefetchScalarGridSpec(
            num_scalar_prefetch=0,
            grid=(B, HW // tp),
            in_specs=[
                # (None, ...) squeezes the batch dim; kernel sees (256, tp).
                pl.BlockSpec((None, IN_CHANNELS, tp), lambda b, p: (b, 0, p)),
                pl.BlockSpec((OUT_CHANNELS, IN_CHANNELS), lambda b, p: (0, 0)),
                pl.BlockSpec((OUT_CHANNELS, 1), lambda b, p: (0, 0)),
            ],
            out_specs=pl.BlockSpec((None, OUT_CHANNELS, tp),
                                   lambda b, p: (b, 0, p)),
        ),
        compiler_params=pltpu.CompilerParams(
            dimension_semantics=("parallel", "parallel")),
    )(x3d, w2d, b2d)

    # Tiny output-side layout fixup (10 channels only) to match
    # permute(0, 2, 3, 1).reshape(-1, 10).
    return jnp.transpose(out3d, (0, 2, 1)).reshape(-1, OUT_CHANNELS)


if __name__ == "__main__":
    key = jax.random.PRNGKey(0)
    k_x, k_w, k_b = jax.random.split(key, 3)

    B, H, W = 2, 16, 16
    x = jax.random.normal(k_x, (B, IN_CHANNELS, H, W), dtype=jnp.float32)

    # Deterministic parameter init (Conv2d(256, 10, kernel_size=1) shapes).
    fan_in = IN_CHANNELS  # 1x1 kernel
    bound = 1.0 / (fan_in ** 0.5)
    weight = jax.random.uniform(
        k_w, (OUT_CHANNELS, IN_CHANNELS, 1, 1),
        minval=-bound, maxval=bound, dtype=jnp.float32)
    bias = jax.random.uniform(
        k_b, (OUT_CHANNELS,), minval=-bound, maxval=bound, dtype=jnp.float32)

    out = classification_head_forward(x, weight, bias)
    out = jax.block_until_ready(out)

    # Reference in plain JAX (1x1 conv == per-pixel matmul over channels).
    ref = jnp.transpose(x, (0, 2, 3, 1)).reshape(-1, IN_CHANNELS) @ \
        weight.reshape(OUT_CHANNELS, IN_CHANNELS).T + bias
    assert out.shape == (B * H * W, OUT_CHANNELS), out.shape
    assert jnp.allclose(out, ref, atol=1e-4, rtol=1e-4)

    print("KERNEL_OK")
</pallas_src>

<mosaic_0001>
module attributes {stable_mosaic.version = 11 : i64} {
  func.func @_cls_head_kernel(%arg0: i32, %arg1: i32, %arg2: memref<1x256x256xf32, #tpu.memory_space<vmem>>, %arg3: memref<10x256xf32, #tpu.memory_space<vmem>>, %arg4: memref<10x1xf32, #tpu.memory_space<vmem>>, %arg5: memref<1x10x256xf32, #tpu.memory_space<vmem>>) attributes {dimension_semantics = [#tpu.dimension_semantics<parallel>, #tpu.dimension_semantics<parallel>], iteration_bounds = array<i64: 2, 1>, scalar_prefetch = 0 : i64, scratch_operands = 0 : i64, tpu.core_type = #tpu.core_type<tc>, window_params = [{transform_indices = @transform_0, window_bounds = array<i64: 1, 256, 256>}, {pipeline_mode = #tpu.pipeline_mode<synchronous>, transform_indices = @transform_1, window_bounds = array<i64: 10, 256>}, {pipeline_mode = #tpu.pipeline_mode<synchronous>, transform_indices = @transform_2, window_bounds = array<i64: 10, 1>}, {transform_indices = @transform_3, window_bounds = array<i64: 1, 10, 256>}]} {
    %c0 = arith.constant 0 : index
    %c0_0 = arith.constant 0 : index
    %0 = vector.load %arg3[%c0, %c0_0] : memref<10x256xf32, #tpu.memory_space<vmem>>, vector<10x256xf32>
    %c0_1 = arith.constant 0 : index
    %c0_2 = arith.constant 0 : index
    %c0_3 = arith.constant 0 : index
    %1 = vector.load %arg2[%c0_1, %c0_2, %c0_3] : memref<1x256x256xf32, #tpu.memory_space<vmem>>, vector<1x256x256xf32>
    %2 = vector.shape_cast %1 : vector<1x256x256xf32> to vector<256x256xf32>
    %cst = arith.constant dense<0.000000e+00> : vector<10x256xf32>
    %3 = tpu.matmul %0, %2, %cst {dimension_numbers = #tpu.dot_dimension_numbers<[1], [0], [0], [1], [0, 0, 1, 1], [], []>} : vector<10x256xf32>, vector<256x256xf32>, vector<10x256xf32> -> vector<10x256xf32>
    %c0_4 = arith.constant 0 : index
    %c0_5 = arith.constant 0 : index
    %4 = vector.load %arg4[%c0_4, %c0_5] : memref<10x1xf32, #tpu.memory_space<vmem>>, vector<10x1xf32>
    %5 = vector.broadcast %4 : vector<10x1xf32> to vector<10x256xf32>
    %6 = arith.addf %3, %5 : vector<10x256xf32>
    %c0_6 = arith.constant 0 : index
    %c0_7 = arith.constant 0 : index
    %c0_8 = arith.constant 0 : index
    %7 = vector.load %arg5[%c0_6, %c0_7, %c0_8] : memref<1x10x256xf32, #tpu.memory_space<vmem>>, vector<1x10x256xf32>
    %8 = vector.shape_cast %7 : vector<1x10x256xf32> to vector<10x256xf32>
    %9 = vector.shape_cast %6 : vector<10x256xf32> to vector<1x10x256xf32>
    tpu.vector_store %arg5[%c0_6, %c0_7, %c0_8], %9 {strides = array<i32>} : memref<1x10x256xf32, #tpu.memory_space<vmem>>, vector<1x10x256xf32>,
    return
  }
  func.func @transform_0(%arg0: i32, %arg1: i32) -> (i32, i32, i32) {
    %c0_i32 = arith.constant 0 : i32
    %c0_i32_0 = arith.constant 0 : i32
    return %arg0, %c0_i32, %arg1 : i32, i32, i32
  }
  func.func @transform_1(%arg0: i32, %arg1: i32) -> (i32, i32) {
    %c0_i32 = arith.constant 0 : i32
    %c0_i32_0 = arith.constant 0 : i32
    %c0_i32_1 = arith.constant 0 : i32
    return %c0_i32, %c0_i32_0 : i32, i32
  }
  func.func @transform_2(%arg0: i32, %arg1: i32) -> (i32, i32) {
    %c0_i32 = arith.constant 0 : i32
    %c0_i32_0 = arith.constant 0 : i32
    %c0_i32_1 = arith.constant 0 : i32
    return %c0_i32, %c0_i32_0 : i32, i32
  }
  func.func @transform_3(%arg0: i32, %arg1: i32) -> (i32, i32, i32) {
    %c0_i32 = arith.constant 0 : i32
    %c0_i32_0 = arith.constant 0 : i32
    return %arg0, %c0_i32, %arg1 : i32, i32, i32
  }
}

</mosaic_0001>

<bundles_post_ra>
// kernel: tpu_custom_call.1
= control target key start
LH: loop header
LB: loop body
LE: loop exit
PB: predicated region body
PF: predicated region fallthrough
CT: control target
= control target key end

     0   :  { %8 = vsyncpa [#allocation3], 0  ;;  %s985_s0 = inlined_call_operand.hbm [shape: f32[2,256,256], index: 0, kind: input, shape index: {}]   ;;  %s986_s1 = inlined_call_operand.hbm [shape: f32[10,256], index: 1, kind: input, shape index: {}]   ;;  %s987_s2 = inlined_call_operand.vmem [shape: f32[10,1], index: 2, kind: input, shape index: {}]   ;;  %s988_s3 = inlined_call_operand.vmem [shape: f32[2,10,256], index: 3, kind: output, shape index: {}]  }
   0x1   :  { %10 = vsyncpa [#allocation3 + $0x1], 0 }
   0x2   :  { %11 = vsyncpa [#allocation5], 0  ;;  %s786_s12 = smov 0   ;;  %s788_s13 = smov 0  }
   0x3   :  { %s790_s14 = smov 0   ;;  %s792_s15 = smov 0  }
   0x4   :  { %s794_s16 = smov 0   ;;  %s796_s17 = smov 0  }
   0x5 LB: > { %s500_s18 = sadd.s32 4294967295, %s759_s17   ;;  %p51_p0 = scmp.ne.s32.totalorder %s743_s13, %s739_s12  ;;  %s759_s17 = sphi %s796_s17, %s17_s17   ;;  %s755_s16 = sphi %s794_s16, %s998_s16   ;;  %s751_s15 = sphi %s792_s15, %s997_s15   ;;  %s747_s14 = sphi %s790_s14, %s996_s14   ;;  %s743_s13 = sphi %s788_s13, %s995_s13   ;;  %s739_s12 = sphi %s786_s12, %s994_s12  }
   0x6   : > { %p816_p1 = scmp.eq.s32.totalorder %s500_s18, 0  ;;  %p502_p2 = scmp.ge.s32.totalorder %s759_s17, 1 }
   0x7   : > { %p132_p3 = scmp.lt.s32.totalorder %s759_s17, 3  ;;  %s761_s22 = smov [#allocation4]  }
   0x8   : > { %p824_p4 = por %p816_p1, %p51_p0  ;;  %s144_s23 = sshll.u32 %s761_s22, 4  ;;  %s145_s23 = int_to_ptr.vmem [resolvable:$true] %s144_s23 }
   0x9   : > { %p828_p5 = pnand %p502_p2, %p132_p3  ;;  %s29_s25 = sadd.s32 1, %s755_s16 }
   0xa   : > { %s662_s26 = scalar_lea.vmem %s145_s23, 512  ;;  %p670_p12 = scmp.lt.s32.totalorder %s145_s23, %s145_s23 }
   0xb   : > { %p587_p6 = pneg %p828_p5  ;;  %p663_p9 = scmp.ne.s32.totalorder %s145_s23, %s662_s26 }
   0xc   : > { %p671_p13 = scmp.lt.s32.totalorder %s662_s26, %s662_s26 }
   0xd   : > { %p836_p7 = pnand %p587_p6, %p816_p1 }
   0xe   : > { %p672_p0 = por %p671_p13, %p670_p12 }
   0xf   : > { %p653_p8 = pneg %p836_p7 }
  0x11   : > { %p665_p10 = pnand %p663_p9, %p653_p8 }
  0x13   : > { %p666_p11 = pneg %p665_p10 }
  0x15   : > { %p673_p2 = pnand %p672_p0, %p666_p11 }
  0x17   : > { %676 = shalt.err (!%p673_p2)
}
  0x18   : > { %s762_s27 = smov 256   ;;  %s763_s28 = smov 16  }
  0x19   : > { %590 = dma.hbm_to_vmem [thread:$0]  (!%p836_p7), %s986_s1, 512, %s145_s23, [#allocation5], %s762_s27, %s762_s27, %s763_s28  }
  0x1a   : > { %p31_p3 = scmp.ge.s32.totalorder %s29_s25, 2  ;;  %s38_s4 = sadd.s32 1, %s747_s14 }
  0x1b   : > { %p45_p6 = scmp.ne.s32.totalorder %s747_s14, %s743_s13  ;;  %p46_p8 = scmp.eq.s32.totalorder %s759_s17, 0 }
  0x1c   : > { %s1000_s25 = smov (%p31_p3, %s29_s25), 0  ;;  %p596_p10 = scmp.lt.s32.totalorder %s759_s17, 2 }
  0x1d   : > { %p47_p9 = por %p46_p8, %p45_p6  ;;  %s33_s5 = ssub.s32 %s755_s16, %s1000_s25 }
  0x1e   : > { %s161_s6 = sand.u32 1, %s747_s14   ;;  %p36_p11 = scmp.eq.s32.totalorder %s33_s5, 0 }
  0x1f   : > { %s505_s7 = sshll.u32 %s161_s6, 9  ;;  %s515_s8 = sshll.u32 %s755_s16, 13 }
  0x20   : > { %s863_s9 = scalar_select %p36_p11, %s747_s14, %s38_s4  }
  0x21   : > { %s173_s12 = scalar_lea.hbm %s985_s0, %s515_s8  ;;  %s165_s18 = scalar_lea.vmem [#allocation2], %s505_s7 }
  0x22   : > { %s174_s22 = sshll.u32 %s165_s18, 4  ;;  %p868_p7 = pnand %p596_p10, %p47_p9  ;;  %s175_s22 = int_to_ptr.vmem [resolvable:$true] %s174_s22 }
  0x23   : > { %s162_s24 = scalar_lea.sflag [#allocation3], %s161_s6  ;;  %s690_s26 = scalar_lea.vmem %s175_s22, 8192 }
  0x24   : > { %p679_p12 = pneg %p868_p7  ;;  %p691_p13 = scmp.ne.s32.totalorder %s175_s22, %s690_s26 }
  0x25   : > { %s764_s29 = smov [#allocation2]  }
  0x26   : > { %p693_p0 = pnand %p691_p13, %p679_p12  ;;  %s695_s30 = sshll.u32 %s764_s29, 4  ;;  %s696_s30 = int_to_ptr.vmem [resolvable:$false] %s695_s30 }
  0x27   : > { %s697_s4 = scalar_lea.vmem %s696_s30, 16384  ;;  %p698_p3 = scmp.lt.s32.totalorder %s175_s22, %s696_s30 }
  0x28   : > { %p694_p2 = pneg %p693_p0  ;;  %p699_p6 = scmp.lt.s32.totalorder %s697_s4, %s690_s26 }
  0x2a   : > { %p700_p8 = por %p699_p6, %p698_p3 }
  0x2c   : > { %p701_p9 = pnand %p700_p8, %p694_p2 }
  0x2e   : > { %704 = shalt.err (!%p701_p9)
}
  0x2f   : > { %594 = dma.hbm_to_vmem [thread:$0]  (!%p868_p7), %s173_s12, 8192, %s175_s22, %s162_s24, %s762_s27, %s762_s27, %s763_s28  }
  0x30   : > { %186 = sbr.rel (%p828_p5) target bundleno = 321 (0x141), region = 32  ;;  %s188_s5 = sand.u32 (!%p828_p5), 1, %s743_s13  }
  0x31   : > { %s509_s6 = sshll.u32 (!%p828_p5), %s188_s5, 9  ;;  %s189_s7 = scalar_lea.sflag (!%p828_p5), [#allocation3], %s188_s5 }
  0x32   : > { %s882_s8 = scalar_lea.vmem (!%p828_p5), [#allocation2], %s509_s6 }
  0x35   : > { %730 = dma.done.wait (%p824_p4), %s189_s7, 8192  }
  0x36   : > { %732 = vsyncadd (%p824_p4), %s189_s7, 4294959104 }
  0x37   : > { %734 = dma.done.wait (%p816_p1), [#allocation5], 512  }
  0x38   : > { %736 = vsyncadd (%p816_p1), [#allocation5], 4294966784  ;;  %v765_v0 = vmov 0   ;;  %v269_v1 = vld [vmem:[%s882_s8 + $0xf8] sm:$0xff]  ;;  %v268_v2 = vld [vmem:[%s882_s8 + $0xf0] sm:$0xff]  ;;  %p225_p1 = scmp.lt.s32.totalorder %s751_s15, 1 }
  0x39   : > { %650 = vset.pattern.permute.xlu0 %v765_v0  ;;  %v267_v3 = vld [vmem:[%s882_s8 + $0xe8] sm:$0xff]  ;;  %314 = vmatprep.subr.mxu0 %v269_v1  ;;  %v266_v4 = vld [vmem:[%s882_s8 + $0xe0] sm:$0xff]  ;;  %v265_v5 = vld [vmem:[%s882_s8 + $0xd8] sm:$0xff] }
  0x3a   : > { %517 = vmatprep.subr.mxu1 %v269_v1  ;;  %315 = vmatpush1.msra.mxu0 %v268_v2  ;;  %v264_v6 = vld [vmem:[%s882_s8 + $0xd0] sm:$0xff]  ;;  %v263_v7 = vld [vmem:[%s882_s8 + $0xc8] sm:$0xff]  ;;  %v262_v8 = vld [vmem:[%s882_s8 + $0xc0] sm:$0xff]  ;;  %s1002_s15 = smov (!%p225_p1, %s751_s15), 1 }
  0x3b   : > { %549 = vmatpush1.msra.mxu1 %v268_v2  ;;  %316 = vmatprep.subr.mxu0 %v267_v3  ;;  %v261_v9 = vld [vmem:[%s882_s8 + $0xb8] sm:$0xff]  ;;  %v260_v10 = vld [vmem:[%s882_s8 + $0xb0] sm:$0xff]  ;;  %v259_v11 = vld [vmem:[%s882_s8 + $0xa8] sm:$0xff]  ;;  %s516_s28 = sshll.u32 %s1002_s15, 5 }
  0x3c   : > { %518 = vmatprep.subr.mxu1 %v267_v3  ;;  %317 = vmatpush1.msra.mxu0 %v266_v4  ;;  %v258_v12 = vld [vmem:[%s882_s8 + $0xa0] sm:$0xff]  ;;  %v257_v13 = vld [vmem:[%s882_s8 + $0x98] sm:$0xff]  ;;  %v256_v14 = vld [vmem:[%s882_s8 + $0x90] sm:$0xff]  ;;  %s232_s12 = scalar_lea.vmem %s988_s3, %s516_s28 }
  0x3d   : > { %550 = vmatpush1.msra.mxu1 %v266_v4  ;;  %318 = vmatprep.subr.mxu0 %v265_v5  ;;  %v255_v15 = vld [vmem:[%s882_s8 + $0x88] sm:$0xff]  ;;  %v254_v16 = vld [vmem:[%s882_s8 + $0x80] sm:$0xff]  ;;  %v253_v17 = vld [vmem:[%s882_s8 + $0x78] sm:$0xff] }
  0x3e   : > { %519 = vmatprep.subr.mxu1 %v265_v5  ;;  %319 = vmatpush1.msra.mxu0 %v264_v6  ;;  %v252_v18 = vld [vmem:[%s882_s8 + $0x70] sm:$0xff]  ;;  %v251_v19 = vld [vmem:[%s882_s8 + $0x68] sm:$0xff]  ;;  %v250_v20 = vld [vmem:[%s882_s8 + $0x60] sm:$0xff] }
  0x3f   : > { %551 = vmatpush1.msra.mxu1 %v264_v6  ;;  %320 = vmatprep.subr.mxu0 %v263_v7  ;;  %v249_v21 = vld [vmem:[%s882_s8 + $0x58] sm:$0xff]  ;;  %v248_v22 = vld [vmem:[%s882_s8 + $0x50] sm:$0xff]  ;;  %v247_v23 = vld [vmem:[%s882_s8 + $0x48] sm:$0xff] }
  0x40   : > { %520 = vmatprep.subr.mxu1 %v263_v7  ;;  %321 = vmatpush1.msra.mxu0 %v262_v8  ;;  %v246_v24 = vld [vmem:[%s882_s8 + $0x40] sm:$0xff]  ;;  %v245_v25 = vld [vmem:[%s882_s8 + $0x38] sm:$0xff]  ;;  %v244_v26 = vld [vmem:[%s882_s8 + $0x30] sm:$0xff] }
  0x41   : > { %552 = vmatpush1.msra.mxu1 %v262_v8  ;;  %322 = vmatprep.subr.mxu0 %v261_v9  ;;  %v243_v27 = vld [vmem:[%s882_s8 + $0x28] sm:$0xff]  ;;  %v242_v28 = vld [vmem:[%s882_s8 + $0x20] sm:$0xff]  ;;  %v241_v29 = vld [vmem:[%s882_s8 + $0x18] sm:$0xff] }
  0x42   : > { %521 = vmatprep.subr.mxu1 %v261_v9  ;;  %323 = vmatpush1.msra.mxu0 %v260_v10  ;;  %v240_v30 = vld [vmem:[%s882_s8 + $0x10] sm:$0xff]  ;;  %v239_v31 = vld [vmem:[%s882_s8 + $0x8] sm:$0xff]  ;;  %v238_v32 = vld [vmem:[%s882_s8] sm:$0xff] }
  0x43   : > { %553 = vmatpush1.msra.mxu1 %v260_v10  ;;  %324 = vmatprep.subr.mxu0 %v259_v11  ;;  %v301_v33 = vld [vmem:[%s882_s8 + $0x1f8] sm:$0xff]  ;;  %v300_v34 = vld [vmem:[%s882_s8 + $0x1f0] sm:$0xff]  ;;  %v299_v35 = vld [vmem:[%s882_s8 + $0x1e8] sm:$0xff] }
  0x44   : > { %522 = vmatprep.subr.mxu1 %v259_v11  ;;  %325 = vmatpush1.msra.mxu0 %v258_v12  ;;  %v298_v36 = vld [vmem:[%s882_s8 + $0x1e0] sm:$0xff]  ;;  %v297_v37 = vld [vmem:[%s882_s8 + $0x1d8] sm:$0xff]  ;;  %v296_v38 = vld [vmem:[%s882_s8 + $0x1d0] sm:$0xff] }
  0x45   : > { %554 = vmatpush1.msra.mxu1 %v258_v12  ;;  %326 = vmatprep.subr.mxu0 %v257_v13  ;;  %v295_v39 = vld [vmem:[%s882_s8 + $0x1c8] sm:$0xff]  ;;  %v294_v40 = vld [vmem:[%s882_s8 + $0x1c0] sm:$0xff]  ;;  %v293_v41 = vld [vmem:[%s882_s8 + $0x1b8] sm:$0xff] }
  0x46   : > { %523 = vmatprep.subr.mxu1 %v257_v13  ;;  %327 = vmatpush1.msra.mxu0 %v256_v14  ;;  %v292_v42 = vld [vmem:[%s882_s8 + $0x1b0] sm:$0xff]  ;;  %v291_v43 = vld [vmem:[%s882_s8 + $0x1a8] sm:$0xff]  ;;  %v290_v44 = vld [vmem:[%s882_s8 + $0x1a0] sm:$0xff] }
  0x47   : > { %555 = vmatpush1.msra.mxu1 %v256_v14  ;;  %328 = vmatprep.subr.mxu0 %v255_v15  ;;  %v289_v45 = vld [vmem:[%s882_s8 + $0x198] sm:$0xff]  ;;  %v288_v46 = vld [vmem:[%s882_s8 + $0x190] sm:$0xff]  ;;  %v287_v47 = vld [vmem:[%s882_s8 + $0x188] sm:$0xff] }
  0x48   : > { %524 = vmatprep.subr.mxu1 %v255_v15  ;;  %329 = vmatpush1.msra.mxu0 %v254_v16  ;;  %v286_v48 = vld [vmem:[%s882_s8 + $0x180] sm:$0xff]  ;;  %v285_v49 = vld [vmem:[%s882_s8 + $0x178] sm:$0xff]  ;;  %v284_v50 = vld [vmem:[%s882_s8 + $0x170] sm:$0xff] }
  0x49   : > { %556 = vmatpush1.msra.mxu1 %v254_v16  ;;  %330 = vmatprep.subr.mxu0 %v253_v17  ;;  %v283_v51 = vld [vmem:[%s882_s8 + $0x168] sm:$0xff]  ;;  %v282_v52 = vld [vmem:[%s882_s8 + $0x160] sm:$0xff]  ;;  %v281_v53 = vld [vmem:[%s882_s8 + $0x158] sm:$0xff] }
  0x4a   : > { %525 = vmatprep.subr.mxu1 %v253_v17  ;;  %331 = vmatpush1.msra.mxu0 %v252_v18  ;;  %v280_v54 = vld [vmem:[%s882_s8 + $0x150] sm:$0xff]  ;;  %v279_v55 = vld [vmem:[%s882_s8 + $0x148] sm:$0xff]  ;;  %v278_v56 = vld [vmem:[%s882_s8 + $0x140] sm:$0xff] }
  0x4b   : > { %557 = vmatpush1.msra.mxu1 %v252_v18  ;;  %332 = vmatprep.subr.mxu0 %v251_v19  ;;  %v277_v57 = vld [vmem:[%s882_s8 + $0x138] sm:$0xff]  ;;  %v276_v58 = vld [vmem:[%s882_s8 + $0x130] sm:$0xff]  ;;  %v275_v59 = vld [vmem:[%s882_s8 + $0x128] sm:$0xff] }
  0x4c   : > { %526 = vmatprep.subr.mxu1 %v251_v19  ;;  %333 = vmatpush1.msra.mxu0 %v250_v20  ;;  %v274_v60 = vld [vmem:[%s882_s8 + $0x120] sm:$0xff]  ;;  %v273_v61 = vld [vmem:[%s882_s8 + $0x118] sm:$0xff]  ;;  %v272_v62 = vld [vmem:[%s882_s8 + $0x110] sm:$0xff] }
  0x4d   : > { %558 = vmatpush1.msra.mxu1 %v250_v20  ;;  %334 = vmatprep.subr.mxu0 %v249_v21  ;;  %v271_v63 = vld [vmem:[%s882_s8 + $0x108] sm:$0xff]  ;;  %v270_v0 = vld [vmem:[%s882_s8 + $0x100] sm:$0xff]  ;;  %v237_v2 = vld [vmem:[#allocation4 + $0x18] sm:$0x3] }
  0x4e   : > { %527 = vmatprep.subr.mxu1 %v249_v21  ;;  %335 = vmatpush1.msra.mxu0 %v248_v22  ;;  %v235_v1 = vld [vmem:[#allocation4 + $0x8] sm:$0xff]  ;;  %v234_v3 = vld [vmem:[#allocation4] sm:$0xff]  ;;  %v236_v4 = vld [vmem:[#allocation4 + $0x10] sm:$0x3] }
  0x4f   : > { %559 = vmatpush1.msra.mxu1 %v248_v22  ;;  %336 = vmatprep.subr.mxu0 %v247_v23  ;;  %v302_v5 = vld [vmem:[%s987_s2] sm:$0xff]  ;;  %v303_v6 = vld [vmem:[%s987_s2 + $0x8] sm:$0x3] }
  0x50   : > { %528 = vmatprep.subr.mxu1 %v247_v23  ;;  %337 = vmatpush1.msra.mxu0 %v246_v24 }
  0x51   : > { %560 = vmatpush1.msra.mxu1 %v246_v24  ;;  %338 = vmatprep.subr.mxu0 %v245_v25 }
  0x52   : > { %529 = vmatprep.subr.mxu1 %v245_v25  ;;  %339 = vmatpush1.msra.mxu0 %v244_v26 }
  0x53   : > { %561 = vmatpush1.msra.mxu1 %v244_v26  ;;  %340 = vmatprep.subr.mxu0 %v243_v27 }
  0x54   : > { %530 = vmatprep.subr.mxu1 %v243_v27  ;;  %341 = vmatpush1.msra.mxu0 %v242_v28 }
  0x55   : > { %562 = vmatpush1.msra.mxu1 %v242_v28  ;;  %342 = vmatprep.subr.mxu0 %v241_v29 }
  0x56   : > { %531 = vmatprep.subr.mxu1 %v241_v29  ;;  %343 = vmatpush1.msra.mxu0 %v240_v30 }
  0x57   : > { %563 = vmatpush1.msra.mxu1 %v240_v30  ;;  %344 = vmatprep.subr.mxu0 %v239_v31 }
  0x58   : > { %532 = vmatprep.subr.mxu1 %v239_v31  ;;  %345 = vmatpush1.msra.mxu0 %v238_v32 }
  0x59   : > { %564 = vmatpush1.msra.mxu1 %v238_v32  ;;  %346 = vmatprep.subr.mxu0 %v301_v33 }
  0x5a   : > { %533 = vmatprep.subr.mxu1 %v301_v33  ;;  %347 = vmatpush2.msra.mxu0 %v300_v34 }
  0x5b   : > { %565 = vmatpush2.msra.mxu1 %v300_v34  ;;  %348 = vmatprep.subr.mxu0 %v299_v35 }
  0x5c   : > { %534 = vmatprep.subr.mxu1 %v299_v35  ;;  %349 = vmatpush2.msra.mxu0 %v298_v36 }
  0x5d   : > { %566 = vmatpush2.msra.mxu1 %v298_v36  ;;  %350 = vmatprep.subr.mxu0 %v297_v37 }
  0x5e   : > { %535 = vmatprep.subr.mxu1 %v297_v37  ;;  %351 = vmatpush2.msra.mxu0 %v296_v38 }
  0x5f   : > { %567 = vmatpush2.msra.mxu1 %v296_v38  ;;  %352 = vmatprep.subr.mxu0 %v295_v39 }
  0x60   : > { %536 = vmatprep.subr.mxu1 %v295_v39  ;;  %353 = vmatpush2.msra.mxu0 %v294_v40 }
  0x61   : > { %568 = vmatpush2.msra.mxu1 %v294_v40  ;;  %354 = vmatprep.subr.mxu0 %v293_v41 }
  0x62   : > { %537 = vmatprep.subr.mxu1 %v293_v41  ;;  %355 = vmatpush2.msra.mxu0 %v292_v42 }
  0x63   : > { %569 = vmatpush2.msra.mxu1 %v292_v42  ;;  %356 = vmatprep.subr.mxu0 %v291_v43 }
  0x64   : > { %538 = vmatprep.subr.mxu1 %v291_v43  ;;  %357 = vmatpush2.msra.mxu0 %v290_v44 }
  0x65   : > { %570 = vmatpush2.msra.mxu1 %v290_v44  ;;  %358 = vmatprep.subr.mxu0 %v289_v45 }
  0x66   : > { %539 = vmatprep.subr.mxu1 %v289_v45  ;;  %359 = vmatpush2.msra.mxu0 %v288_v46 }
  0x67   : > { %571 = vmatpush2.msra.mxu1 %v288_v46  ;;  %360 = vmatprep.subr.mxu0 %v287_v47 }
  0x68   : > { %540 = vmatprep.subr.mxu1 %v287_v47  ;;  %361 = vmatpush2.msra.mxu0 %v286_v48 }
  0x69   : > { %572 = vmatpush2.msra.mxu1 %v286_v48  ;;  %362 = vmatprep.subr.mxu0 %v285_v49 }
  0x6a   : > { %541 = vmatprep.subr.mxu1 %v285_v49  ;;  %363 = vmatpush2.msra.mxu0 %v284_v50 }
  0x6b   : > { %573 = vmatpush2.msra.mxu1 %v284_v50  ;;  %364 = vmatprep.subr.mxu0 %v283_v51 }
  0x6c   : > { %542 = vmatprep.subr.mxu1 %v283_v51  ;;  %365 = vmatpush2.msra.mxu0 %v282_v52 }
  0x6d   : > { %574 = vmatpush2.msra.mxu1 %v282_v52  ;;  %366 = vmatprep.subr.mxu0 %v281_v53 }
  0x6e   : > { %543 = vmatprep.subr.mxu1 %v281_v53  ;;  %367 = vmatpush2.msra.mxu0 %v280_v54 }
  0x6f   : > { %575 = vmatpush2.msra.mxu1 %v280_v54  ;;  %368 = vmatprep.subr.mxu0 %v279_v55 }
  0x70   : > { %544 = vmatprep.subr.mxu1 %v279_v55  ;;  %369 = vmatpush2.msra.mxu0 %v278_v56 }
  0x71   : > { %576 = vmatpush2.msra.mxu1 %v278_v56  ;;  %370 = vmatprep.subr.mxu0 %v277_v57 }
  0x72   : > { %545 = vmatprep.subr.mxu1 %v277_v57  ;;  %371 = vmatpush2.msra.mxu0 %v276_v58 }
  0x73   : > { %577 = vmatpush2.msra.mxu1 %v276_v58  ;;  %372 = vmatprep.subr.mxu0 %v275_v59 }
  0x74   : > { %546 = vmatprep.subr.mxu1 %v275_v59  ;;  %373 = vmatpush2.msra.mxu0 %v274_v60 }
  0x75   : > { %578 = vmatpush2.msra.mxu1 %v274_v60  ;;  %374 = vmatprep.subr.mxu0 %v273_v61 }
  0x76   : > { %547 = vmatprep.subr.mxu1 %v273_v61  ;;  %375 = vmatpush2.msra.mxu0 %v272_v62 }
  0x77   : > { %579 = vmatpush2.msra.mxu1 %v272_v62  ;;  %376 = vmatprep.subr.mxu0 %v271_v63 }
  0x78   : > { %548 = vmatprep.subr.mxu1 %v271_v63  ;;  %377 = vmatpush2.msra.mxu0 %v270_v0 }
  0x79   : > { %580 = vmatpush2.msra.mxu1 %v270_v0  ;;  %378 = vmatprep.mubr.f32.mxu0 %v235_v1 }
  0x7a   : > { %384 = vmatprep.mubr.f32.mxu1 %v237_v2  ;;  %379 = vmatmul.mubr.f32.vlgmr.msra.gmra.mxu0 %v234_v3 }
  0x7b   : > { %385 = vmatmul.mubr.f32.vlgmr.msra.gmra.mxu1 %v236_v4  ;;  %306 = vperm.xlu0 %650, %v302_v5  }
  0x7f   : > { %311 = vperm.xlu0 %650, %v303_v6  }
  0xf6   : > { %v307_v7 = vpop.permute.xlu0 %306 }
  0xfa   : > { %v312_v8 = vpop.permute.xlu0 %311 }
 0x13a   : > { %v380_v9 = vpop.f32.mrf.mxu0 }
 0x13b   : > { %v386_v10 = vpop.f32.mrf.mxu1  ;;  %v381_v11 = vadd.f32 %v380_v9, %v307_v7 }
 0x13c   : > { %v387_v12 = vadd.f32 %v386_v10, %v312_v8  ;;  %v382_v13 = vpop.f32.mrf.mxu0 }
 0x13d   : > { %v388_v14 = vpop.f32.mrf.mxu1  ;;  %391 = vst [vmem:[%s232_s12] sm:$0xff] %v381_v11  ;;  %v383_v15 = vadd.f32 %v382_v13, %v307_v7 }
 0x13e   : > { %393 = vst [vmem:[%s232_s12 + $0x10] sm:$0x3] %v387_v12  ;;  %v389_v16 = vadd.f32 %v388_v14, %v312_v8 }
 0x13f   : > { %392 = vst [vmem:[%s232_s12 + $0x8] sm:$0xff] %v383_v15 }
 0x140   : > { %394 = vst [vmem:[%s232_s12 + $0x18] sm:$0x3] %v389_v16 }
 0x141 PF: > { %s17_s17 = sadd.s32 1, %s759_s17   ;;  %s994_s12 = smov %s743_s13 }
 0x142   : > { %p14_p4 = scmp.ge.s32.totalorder %s17_s17, 4   ;;  %s995_s13 = smov %s747_s14 }
 0x143   : > { %s996_s14 = smov %s863_s9  ;;  %s997_s15 = smov %s755_s16 }
 0x144   : > { %s998_s16 = smov %s1000_s25  ;;  %16 = sbr.rel (!%p14_p4) target bundleno = 5 (0x5), region = 76 }
 0x149   :  { %425 = vsyncpa [#allocation3], 1 }
 0x14a   :  { %427 = vsyncpa [#allocation3 + $0x1], 1 }
 0x14b   :  { %428 = vsyncpa [#allocation5], 1 }

</bundles_post_ra>
